<compile_context>
chip_gen: v5e
topology: v5e:2x2
jax: 0.10.0
libtpu: 0.0.40
codegen_flags: <defaults>
</compile_context>

<pallas_src>
import jax
import jax.numpy as jnp
import numpy as np
from jax.experimental import pallas as pl
from jax.experimental.pallas import tpu as pltpu

LANE = 128
SUBLANE = 8


def _round_up(x, m):
    return ((x + m - 1) // m) * m


def actor_kernel(x_ref, w1_ref, b1_ref, w2_ref, b2_ref, w3_ref, b3_ref, o_ref):
    # x tile: (TM, state_dim) f32; weights bf16; biases f32; output bf16.
    x = x_ref[...].astype(jnp.bfloat16)                            # cast in-kernel
    h1 = jnp.dot(x, w1_ref[...], preferred_element_type=jnp.float32)
    h1 = jnp.maximum(h1 + b1_ref[...], 0.0)                        # relu (f32 VPU)
    h2 = jnp.dot(h1.astype(jnp.bfloat16), w2_ref[...],
                 preferred_element_type=jnp.float32)
    h2 = jnp.maximum(h2 + b2_ref[...], 0.0)                        # relu (f32 VPU)
    y = jnp.dot(h2.astype(jnp.bfloat16), w3_ref[...],
                preferred_element_type=jnp.float32)
    o_ref[...] = jnp.tanh(y + b3_ref[...]).astype(o_ref.dtype)     # tanh (f32 EUP)


def actor_forward(state, params, *, tile_m=1024, min_tiles=2):
    """state: (B, state_dim) f32.  params: from init_actor_params.

    min_tiles=2 keeps both v7x TensorCores busy for moderate batches; on
    single-core v5e/v6e the extra grid step costs ~0.35 us (negligible).
    """
    w1, b1 = params["w1"], params["b1"]
    w2, b2 = params["w2"], params["b2"]
    w3, b3 = params["w3"], params["b3"]
    state_dim = params["state_dim"]
    action_dim = params["action_dim"]

    B = state.shape[0]
    S = w1.shape[0]            # = state_dim (unpadded K for layer 1)
    H0p = w1.shape[1]
    H1p = w2.shape[1]
    Ap = w3.shape[1]

    # Batch tiling: pad only to sublane multiple, then to balanced tiles.
    Bp0 = _round_up(B, SUBLANE)
    nt = pl.cdiv(Bp0, tile_m)
    if Bp0 >= 2 * SUBLANE:
        nt = max(nt, min_tiles)
    TM = _round_up(pl.cdiv(Bp0, nt), SUBLANE)
    Bp = nt * TM
    grid = (nt,)

    # Only row (batch) padding; feature dim stays unpadded, cast done in-kernel.
    x = state
    if Bp != B:
        x = jnp.pad(state, ((0, Bp - B), (0, 0)))

    flops = 2 * Bp * (S * H0p + H0p * H1p + H1p * Ap)
    bytes_accessed = (x.size * 4
                      + (w1.size + w2.size + w3.size) * 2
                      + (b1.size + b2.size + b3.size) * 4
                      + Bp * Ap * 2)
    cost = pl.CostEstimate(flops=flops,
                           transcendentals=Bp * Ap,
                           bytes_accessed=bytes_accessed)

    out = pl.pallas_call(
        actor_kernel,
        out_shape=jax.ShapeDtypeStruct((Bp, Ap), jnp.bfloat16),
        grid=grid,
        in_specs=[
            pl.BlockSpec((TM, S), lambda i: (i, 0)),      # x: tiled over batch
            pl.BlockSpec((S, H0p), lambda i: (0, 0)),     # weights: VMEM-resident
            pl.BlockSpec((1, H0p), lambda i: (0, 0)),
            pl.BlockSpec((H0p, H1p), lambda i: (0, 0)),
            pl.BlockSpec((1, H1p), lambda i: (0, 0)),
            pl.BlockSpec((H1p, Ap), lambda i: (0, 0)),
            pl.BlockSpec((1, Ap), lambda i: (0, 0)),
        ],
        out_specs=pl.BlockSpec((TM, Ap), lambda i: (i, 0)),
        compiler_params=pltpu.CompilerParams(
            dimension_semantics=("parallel",)),           # shards across v7x's 2 TCs
        cost_estimate=cost,
    )(x, w1, b1, w2, b2, w3, b3)

    # Strip batch/lane padding and promote to f32 outside the kernel.
    return out[:B, :action_dim].astype(jnp.float32)


def init_actor_params(key, state_dim, action_dim, hidden=(400, 300), init_w=0.003):
    """Deterministic re-implementation of Actor.__init__/init_weights.

    PyTorch stores Linear weight as (out, in); fanin_init uses size[0] (= out)
    as fan-in, reproduced here exactly.  init_weights only touches weights, so
    biases keep nn.Linear's default U(-1/sqrt(in_features), 1/sqrt(in_features)).
    Weights are returned transposed to (in, out); only the *output* feature
    dims are zero-padded to 128-lane multiples (layer-1 K stays = state_dim);
    weights are bf16 for the MXU, biases stay f32.
    """
    h0, h1 = hidden
    ks = jax.random.split(key, 6)

    def u(k, shape, bound):
        return jax.random.uniform(k, shape, jnp.float32, -bound, bound)

    # fc1: weight (h0, state_dim), fanin_init fanin = h0
    w1 = u(ks[0], (h0, state_dim), 1.0 / np.sqrt(h0)).T          # -> (state_dim, h0)
    b1 = u(ks[1], (1, h0), 1.0 / np.sqrt(state_dim))
    # fc2: weight (h1, h0), fanin_init fanin = h1
    w2 = u(ks[2], (h1, h0), 1.0 / np.sqrt(h1)).T                 # -> (h0, h1)
    b2 = u(ks[3], (1, h1), 1.0 / np.sqrt(h0))
    # fc3: weight uniform(-init_w, init_w); bias keeps default Linear init
    w3 = u(ks[4], (action_dim, h1), init_w).T                    # -> (h1, action_dim)
    b3 = u(ks[5], (1, action_dim), 1.0 / np.sqrt(h1))

    H0p = _round_up(h0, LANE)
    H1p = _round_up(h1, LANE)
    Ap = _round_up(action_dim, LANE)

    def pad2(a, rows, cols):
        return jnp.pad(a, ((0, rows - a.shape[0]), (0, cols - a.shape[1])))

    return dict(
        w1=pad2(w1, state_dim, H0p).astype(jnp.bfloat16),        # K stays unpadded
        b1=pad2(b1, 1, H0p),
        w2=pad2(w2, H0p, H1p).astype(jnp.bfloat16),
        b2=pad2(b2, 1, H1p),
        w3=pad2(w3, H1p, Ap).astype(jnp.bfloat16),
        b3=pad2(b3, 1, Ap),
        state_dim=state_dim,
        action_dim=action_dim,
    )


if __name__ == "__main__":
    key = jax.random.PRNGKey(0)
    k_params, k_state = jax.random.split(key)

    batch = 4
    state_dim = 16
    action_dim = 8
    hidden = (400, 300)

    params = init_actor_params(k_params, state_dim, action_dim, hidden)
    state = jax.random.normal(k_state, (batch, state_dim), jnp.float32)

    out = actor_forward(state, params)
    out = jax.block_until_ready(out)

    # Pure-JAX reference using the exact same padded bf16 weights / f32 biases
    # and the same precision path (bf16 MXU operands, f32 accum, bf16 store).
    xb = state.astype(jnp.bfloat16)
    h1 = jnp.maximum(
        jnp.dot(xb, params["w1"], preferred_element_type=jnp.float32)
        + params["b1"], 0.0)
    h2 = jnp.maximum(
        jnp.dot(h1.astype(jnp.bfloat16), params["w2"],
                preferred_element_type=jnp.float32) + params["b2"], 0.0)
    ref = jnp.tanh(
        jnp.dot(h2.astype(jnp.bfloat16), params["w3"],
                preferred_element_type=jnp.float32) + params["b3"])
    ref = ref.astype(jnp.bfloat16)[:, :action_dim].astype(jnp.float32)

    np.testing.assert_allclose(np.asarray(out), np.asarray(ref),
                               rtol=1e-2, atol=1e-2)
    assert out.shape == (batch, action_dim)
    assert out.dtype == jnp.float32
    print("KERNEL_OK")
</pallas_src>

<mosaic_0001>
module attributes {stable_mosaic.version = 11 : i64} {
  func.func @actor_kernel(%arg0: i32, %arg1: memref<8x16xf32, #tpu.memory_space<vmem>>, %arg2: memref<16x512xbf16, #tpu.memory_space<vmem>>, %arg3: memref<1x512xf32, #tpu.memory_space<vmem>>, %arg4: memref<512x384xbf16, #tpu.memory_space<vmem>>, %arg5: memref<1x384xf32, #tpu.memory_space<vmem>>, %arg6: memref<384x128xbf16, #tpu.memory_space<vmem>>, %arg7: memref<1x128xf32, #tpu.memory_space<vmem>>, %arg8: memref<8x128xbf16, #tpu.memory_space<vmem>>) attributes {dimension_semantics = [#tpu.dimension_semantics<parallel>], iteration_bounds = array<i64: 1>, scalar_prefetch = 0 : i64, scratch_operands = 0 : i64, tpu.core_type = #tpu.core_type<tc>, window_params = [{transform_indices = @transform_0, window_bounds = array<i64: 8, 16>}, {pipeline_mode = #tpu.pipeline_mode<synchronous>, transform_indices = @transform_1, window_bounds = array<i64: 16, 512>}, {pipeline_mode = #tpu.pipeline_mode<synchronous>, transform_indices = @transform_2, window_bounds = array<i64: 1, 512>}, {pipeline_mode = #tpu.pipeline_mode<synchronous>, transform_indices = @transform_3, window_bounds = array<i64: 512, 384>}, {pipeline_mode = #tpu.pipeline_mode<synchronous>, transform_indices = @transform_4, window_bounds = array<i64: 1, 384>}, {pipeline_mode = #tpu.pipeline_mode<synchronous>, transform_indices = @transform_5, window_bounds = array<i64: 384, 128>}, {pipeline_mode = #tpu.pipeline_mode<synchronous>, transform_indices = @transform_6, window_bounds = array<i64: 1, 128>}, {transform_indices = @transform_7, window_bounds = array<i64: 8, 128>}]} {
    %c0 = arith.constant 0 : index
    %c0_0 = arith.constant 0 : index
    %0 = vector.load %arg1[%c0, %c0_0] : memref<8x16xf32, #tpu.memory_space<vmem>>, vector<8x16xf32>
    %1 = arith.truncf %0 : vector<8x16xf32> to vector<8x16xbf16>
    %c0_1 = arith.constant 0 : index
    %c0_2 = arith.constant 0 : index
    %2 = vector.load %arg2[%c0_1, %c0_2] : memref<16x512xbf16, #tpu.memory_space<vmem>>, vector<16x512xbf16>
    %cst = arith.constant dense<0.000000e+00> : vector<8x512xf32>
    %3 = tpu.matmul %1, %2, %cst {dimension_numbers = #tpu.dot_dimension_numbers<[1], [0], [0], [1], [0, 0, 1, 1], [], []>} : vector<8x16xbf16>, vector<16x512xbf16>, vector<8x512xf32> -> vector<8x512xf32>
    %c0_3 = arith.constant 0 : index
    %c0_4 = arith.constant 0 : index
    %4 = vector.load %arg3[%c0_3, %c0_4] : memref<1x512xf32, #tpu.memory_space<vmem>>, vector<1x512xf32>
    %5 = vector.broadcast %4 : vector<1x512xf32> to vector<8x512xf32>
    %6 = arith.addf %3, %5 : vector<8x512xf32>
    %cst_5 = arith.constant 0.000000e+00 : f32
    %7 = vector.broadcast %cst_5 : f32 to vector<8x512xf32>
    %8 = arith.maximumf %6, %7 : vector<8x512xf32>
    %9 = arith.truncf %8 : vector<8x512xf32> to vector<8x512xbf16>
    %c0_6 = arith.constant 0 : index
    %c0_7 = arith.constant 0 : index
    %10 = vector.load %arg4[%c0_6, %c0_7] : memref<512x384xbf16, #tpu.memory_space<vmem>>, vector<512x384xbf16>
    %cst_8 = arith.constant dense<0.000000e+00> : vector<8x384xf32>
    %11 = tpu.matmul %9, %10, %cst_8 {dimension_numbers = #tpu.dot_dimension_numbers<[1], [0], [0], [1], [0, 0, 1, 1], [], []>} : vector<8x512xbf16>, vector<512x384xbf16>, vector<8x384xf32> -> vector<8x384xf32>
    %c0_9 = arith.constant 0 : index
    %c0_10 = arith.constant 0 : index
    %12 = vector.load %arg5[%c0_9, %c0_10] : memref<1x384xf32, #tpu.memory_space<vmem>>, vector<1x384xf32>
    %13 = vector.broadcast %12 : vector<1x384xf32> to vector<8x384xf32>
    %14 = arith.addf %11, %13 : vector<8x384xf32>
    %cst_11 = arith.constant 0.000000e+00 : f32
    %15 = vector.broadcast %cst_11 : f32 to vector<8x384xf32>
    %16 = arith.maximumf %14, %15 : vector<8x384xf32>
    %17 = arith.truncf %16 : vector<8x384xf32> to vector<8x384xbf16>
    %c0_12 = arith.constant 0 : index
    %c0_13 = arith.constant 0 : index
    %18 = vector.load %arg6[%c0_12, %c0_13] : memref<384x128xbf16, #tpu.memory_space<vmem>>, vector<384x128xbf16>
    %cst_14 = arith.constant dense<0.000000e+00> : vector<8x128xf32>
    %19 = tpu.matmul %17, %18, %cst_14 {dimension_numbers = #tpu.dot_dimension_numbers<[1], [0], [0], [1], [0, 0, 1, 1], [], []>} : vector<8x384xbf16>, vector<384x128xbf16>, vector<8x128xf32> -> vector<8x128xf32>
    %c0_15 = arith.constant 0 : index
    %c0_16 = arith.constant 0 : index
    %20 = vector.load %arg7[%c0_15, %c0_16] : memref<1x128xf32, #tpu.memory_space<vmem>>, vector<1x128xf32>
    %21 = vector.broadcast %20 : vector<1x128xf32> to vector<8x128xf32>
    %22 = arith.addf %19, %21 : vector<8x128xf32>
    %23 = math.tanh %22 : vector<8x128xf32>
    %24 = arith.truncf %23 : vector<8x128xf32> to vector<8x128xbf16>
    %c0_17 = arith.constant 0 : index
    %c0_18 = arith.constant 0 : index
    %25 = vector.load %arg8[%c0_17, %c0_18] : memref<8x128xbf16, #tpu.memory_space<vmem>>, vector<8x128xbf16>
    tpu.vector_store %arg8[%c0_17, %c0_18], %24 {strides = array<i32>} : memref<8x128xbf16, #tpu.memory_space<vmem>>, vector<8x128xbf16>,
    return
  }
  func.func @transform_0(%arg0: i32) -> (i32, i32) {
    %c0_i32 = arith.constant 0 : i32
    %c0_i32_0 = arith.constant 0 : i32
    return %arg0, %c0_i32 : i32, i32
  }
  func.func @transform_1(%arg0: i32) -> (i32, i32) {
    %c0_i32 = arith.constant 0 : i32
    %c0_i32_0 = arith.constant 0 : i32
    %c0_i32_1 = arith.constant 0 : i32
    return %c0_i32, %c0_i32_0 : i32, i32
  }
  func.func @transform_2(%arg0: i32) -> (i32, i32) {
    %c0_i32 = arith.constant 0 : i32
    %c0_i32_0 = arith.constant 0 : i32
    %c0_i32_1 = arith.constant 0 : i32
    return %c0_i32, %c0_i32_0 : i32, i32
  }
  func.func @transform_3(%arg0: i32) -> (i32, i32) {
    %c0_i32 = arith.constant 0 : i32
    %c0_i32_0 = arith.constant 0 : i32
    %c0_i32_1 = arith.constant 0 : i32
    return %c0_i32, %c0_i32_0 : i32, i32
  }
  func.func @transform_4(%arg0: i32) -> (i32, i32) {
    %c0_i32 = arith.constant 0 : i32
    %c0_i32_0 = arith.constant 0 : i32
    %c0_i32_1 = arith.constant 0 : i32
    return %c0_i32, %c0_i32_0 : i32, i32
  }
  func.func @transform_5(%arg0: i32) -> (i32, i32) {
    %c0_i32 = arith.constant 0 : i32
    %c0_i32_0 = arith.constant 0 : i32
    %c0_i32_1 = arith.constant 0 : i32
    return %c0_i32, %c0_i32_0 : i32, i32
  }
  func.func @transform_6(%arg0: i32) -> (i32, i32) {
    %c0_i32 = arith.constant 0 : i32
    %c0_i32_0 = arith.constant 0 : i32
    %c0_i32_1 = arith.constant 0 : i32
    return %c0_i32, %c0_i32_0 : i32, i32
  }
  func.func @transform_7(%arg0: i32) -> (i32, i32) {
    %c0_i32 = arith.constant 0 : i32
    %c0_i32_0 = arith.constant 0 : i32
    return %arg0, %c0_i32 : i32, i32
  }
}

</mosaic_0001>

<bundles_post_ra>
// kernel: tpu_custom_call.1
= control target key start
LH: loop header
LB: loop body
LE: loop exit
PB: predicated region body
PF: predicated region fallthrough
CT: control target
= control target key end

     0   :  { %12 = vsyncpa [#allocation3], 0  ;;  %s2172_s0 = inlined_call_operand.hbm [shape: f32[8,16], index: 0, kind: input, shape index: {}]   ;;  %s2173_s1 = inlined_call_operand.hbm [shape: bf16[16,512], index: 1, kind: input, shape index: {}]   ;;  %s2174_s2 = inlined_call_operand.hbm [shape: f32[1,512], index: 2, kind: input, shape index: {}]   ;;  %s2175_s3 = inlined_call_operand.hbm [shape: bf16[512,384], index: 3, kind: input, shape index: {}]   ;;  %s2176_s4 = inlined_call_operand.vmem [shape: f32[1,384], index: 4, kind: input, shape index: {}]   ;;  %s2177_s5 = inlined_call_operand.hbm [shape: bf16[384,128], index: 5, kind: input, shape index: {}]   ;;  %s2178_s6 = inlined_call_operand.vmem [shape: f32[1,128], index: 6, kind: input, shape index: {}]   ;;  %s2179_s7 = inlined_call_operand.hbm [shape: bf16[8,128], index: 7, kind: output, shape index: {}]  }
   0x1   :  { %13 = vsyncpa [#allocation6], 0 }
   0x2   :  { %14 = vsyncpa [#allocation9], 0  ;;  %s31_s26 = sshll.u32 %s2173_s1, 4  ;;  %s32_s26 = int_to_ptr.hbm [resolvable:$true] %s31_s26 }
   0x3   :  { %15 = vsyncpa [#allocation4], 0  ;;  %s2060_s27 = smov [#allocation5]   ;;  %s55_s8 = sshll.u32 %s2175_s3, 4  ;;  %s56_s8 = int_to_ptr.hbm [resolvable:$true] %s55_s8 }
   0x4   :  { %s33_s28 = sshll.u32 %s2060_s27, 4  ;;  %s2061_s9 = smov 256   ;;  %s34_s28 = int_to_ptr.vmem [resolvable:$true] %s33_s28 }
   0x5   :  { %s2062_s10 = smov 16   ;;  %s2063_s11 = smov [#allocation8]  }
   0x6   :  { %39 = dma.hbm_to_vmem [thread:$0]  %s32_s26, 512, %s34_s28, [#allocation6], %s2061_s9, %s2061_s9, %s2062_s10  }
   0x7   :  { %s57_s12 = sshll.u32 %s2063_s11, 4  ;;  %s2064_s13 = smov 192   ;;  %s58_s12 = int_to_ptr.vmem [resolvable:$true] %s57_s12 }
   0x8   :  { %s2065_s14 = smov 12   ;;  %s21_s16 = sshll.u32 %s2172_s0, 4  ;;  %s22_s16 = int_to_ptr.hbm [resolvable:$true] %s21_s16 }
   0x9   :  { %63 = dma.hbm_to_vmem [thread:$0]  %s56_s8, 12288, %s58_s12, [#allocation9], %s2064_s13, %s2064_s13, %s2065_s14  }
   0xa   :  { %s2066_s17 = smov [#allocation2]   ;;  %s45_s20 = sshll.u32 %s2174_s2, 4  ;;  %s46_s20 = int_to_ptr.hbm [resolvable:$true] %s45_s20 }
   0xb   :  { %s23_s18 = sshll.u32 %s2066_s17, 4  ;;  %s2067_s21 = smov [#allocation7]   ;;  %s24_s18 = int_to_ptr.vmem [resolvable:$true] %s23_s18 }
   0xc   :  { %26 = dma.hbm_to_vmem [thread:$0]  %s22_s16, 128, %s24_s18, [#allocation3]  }
   0xd   :  { %s47_s22 = sshll.u32 %s2067_s21, 4  ;;  %s70_s25 = sshll.u32 %s2177_s5, 4  ;;  %s48_s22 = int_to_ptr.vmem [resolvable:$true] %s47_s22  ;;  %s71_s25 = int_to_ptr.hbm [resolvable:$true] %s70_s25 }
   0xe   :  { %50 = dma.hbm_to_vmem [thread:$0]  %s46_s20, 64, %s48_s22, [#allocation6]  }
   0xf   :  { %s2068_s0 = smov [#allocation10]   ;;  %s2069_s27 = smov 64  }
  0x10   :  { %s72_s26 = sshll.u32 %s2068_s0, 4  ;;  %s2070_s28 = smov 4   ;;  %s73_s26 = int_to_ptr.vmem [resolvable:$true] %s72_s26 }
  0x11   :  { %78 = dma.hbm_to_vmem [thread:$0]  %s71_s25, 3072, %s73_s26, [#allocation9], %s2069_s27, %s2069_s27, %s2070_s28  }
  0x12   :  { %2052 = dma.done.wait [#allocation3], 128  }
  0x13   :  { %2053 = vsyncadd [#allocation3], 4294967168 }
  0x14   :  { %2054 = dma.done.wait [#allocation6], 576  }
  0x15   :  { %2055 = vsyncadd [#allocation6], 4294966720 }
  0x16   :  { %2056 = dma.done.wait [#allocation9], 15360  }
  0x17   :  { %2057 = vsyncadd [#allocation9], 4294951936  ;;  %v1271_v0 = vld [vmem:[#allocation5] sm:$0xf]  ;;  %v1771_v1 = vld [vmem:[#allocation5 + $0xc] sm:$0xf0] }
  0x18   :  { %v1769_v2 = vld [vmem:[#allocation5 + $0x4] sm:$0xf]  ;;  %v1272_v3 = vor.u32 %v1771_v1, %v1271_v0  ;;  %v1273_v4 = vld [vmem:[#allocation5 + $0x10] sm:$0xf0]  ;;  %v1279_v5 = vld [vmem:[#allocation5 + $0x8] sm:$0xf] }
  0x19   :  { %v1772_v6 = vld [vmem:[#allocation5 + $0x14] sm:$0xf0]  ;;  %v1276_v7 = vor.u32 %v1769_v2, %v1273_v4  ;;  %vm138_vm0 = vcmask 130048   ;;  %v1770_v10 = vld [vmem:[#allocation5 + $0xc] sm:$0xf]  ;;  %s2071_s30 = smov [#allocation11]  }
  0x1a   :  { %v1280_v8 = vor.u32 %v1772_v6, %v1279_v5  ;;  %v102_v9 = vld [vmem:[#allocation2] sm:$0xff]  ;;  %149 = vmatpush.bf16.msra.mxu3 %v1272_v3  ;;  %v1471_v14 = vld [vmem:[#allocation8 + $0x168] sm:$0xf]  ;;  %v1459_v16 = vld [vmem:[#allocation8 + $0x150] sm:$0xf]  ;;  %s1255_s8 = sshll.u32 %s2071_s30, 4  ;;  %s1256_s8 = int_to_ptr.vmem [resolvable:$true] %s1255_s8 }
  0x1b   :  { %v1281_v11 = vld [vmem:[#allocation5 + $0x18] sm:$0xf0]  ;;  %v2127_v12 = vpack.c.bf16 %v102_v9, %v102_v9  ;;  %v1819_v15 = vld [vmem:[#allocation8 + $0x170] sm:$0xf0]  ;;  %162 = vmatpush.bf16.msra.mxu1 %v1276_v7  ;;  %v1816_v18 = vld [vmem:[#allocation8 + $0x158] sm:$0xf0] }
  0x1c   :  { %v1284_v13 = vor.u32 %v1770_v10, %v1281_v11  ;;  %175 = vmatpush.bf16.msra.mxu2 %v1280_v8  ;;  %v1472_v17 = vor.u32 %v1819_v15, %v1471_v14  ;;  %v1375_v19 = vld [vmem:[#allocation8 + $0xa8] sm:$0xf]  ;;  %v1795_v20 = vld [vmem:[#allocation8 + $0xb0] sm:$0xf0]  ;;  %v1460_v24 = vor.u32 %v1816_v18, %v1459_v16  ;;  %v1447_v26 = vld [vmem:[#allocation8 + $0x138] sm:$0xf] }
  0x1d   :  { %v1376_v21 = vor.u32 %v1795_v20, %v1375_v19  ;;  %v1567_v22 = vld [vmem:[#allocation8 + $0x228] sm:$0xf]  ;;  %v1843_v23 = vld [vmem:[#allocation8 + $0x230] sm:$0xf0]  ;;  %1285 = vmatmul.msk.bf16.vlgmr.msra.gmra.mxu3 %vm138_vm0, %v2127_v12  ;;  %v1363_v27 = vld [vmem:[#allocation8 + $0x90] sm:$0xf] }
  0x1e   :  { %188 = vmatpush.bf16.msrb.mxu3 %v1284_v13  ;;  %v1568_v25 = vor.u32 %v1843_v23, %v1567_v22  ;;  %v1792_v28 = vld [vmem:[#allocation8 + $0x98] sm:$0xf0]  ;;  %1286 = vmatmul.msk.bf16.vlgmr.msra.gmra.mxu1 %vm138_vm0, %v2127_v12  ;;  %v1813_v29 = vld [vmem:[#allocation8 + $0x140] sm:$0xf0]  ;;  %v1555_v30 = vld [vmem:[#allocation8 + $0x210] sm:$0xf] }
  0x1f   :  { %863 = vmatpush.bf16.msrb.mxu1 %v1472_v17  ;;  %1287 = vmatmul.msk.bf16.vlgmr.msra.gmra.mxu2 %vm138_vm0, %v2127_v12  ;;  %v1840_v31 = vld [vmem:[#allocation8 + $0x218] sm:$0xf0]  ;;  %v1364_v32 = vor.u32 %v1792_v28, %v1363_v27  ;;  %v1351_v34 = vld [vmem:[#allocation8 + $0x78] sm:$0xf]  ;;  %v1789_v35 = vld [vmem:[#allocation8 + $0x80] sm:$0xf0]  ;;  %v1448_v38 = vor.u32 %v1813_v29, %v1447_v26 }
  0x20   :  { %850 = vmatpush.bf16.msra.mxu0 %v1376_v21  ;;  %876 = vmatpush.bf16.msrb.mxu2 %v1568_v25  ;;  %v1556_v33 = vor.u32 %v1840_v31, %v1555_v30  ;;  %v1543_v36 = vld [vmem:[#allocation8 + $0x1f8] sm:$0xf]  ;;  %v1837_v37 = vld [vmem:[#allocation8 + $0x200] sm:$0xf0]  ;;  %v1435_v39 = vld [vmem:[#allocation8 + $0x120] sm:$0xf]  ;;  %v1352_v41 = vor.u32 %v1789_v35, %v1351_v34 }
  0x21   :  { %v1810_v40 = vld [vmem:[#allocation8 + $0x128] sm:$0xf0]  ;;  %v1544_v42 = vor.u32 %v1837_v37, %v1543_v36  ;;  %v1339_v43 = vld [vmem:[#allocation8 + $0x60] sm:$0xf]  ;;  %v1663_v47 = vld [vmem:[#allocation8 + $0x2e8] sm:$0xf] }
  0x22   :  { %v1786_v44 = vld [vmem:[#allocation8 + $0x68] sm:$0xf0]  ;;  %v1531_v45 = vld [vmem:[#allocation8 + $0x1e0] sm:$0xf]  ;;  %v1436_v48 = vor.u32 %v1810_v40, %v1435_v39  ;;  %v1867_v49 = vld [vmem:[#allocation8 + $0x2f0] sm:$0xf0] }
  0x23   :  { %864 = vmatpush.bf16.msrb.mxu1 %v1460_v24  ;;  %v1834_v46 = vld [vmem:[#allocation8 + $0x1e8] sm:$0xf0]  ;;  %v1423_v50 = vld [vmem:[#allocation8 + $0x108] sm:$0xf]  ;;  %v1807_v51 = vld [vmem:[#allocation8 + $0x110] sm:$0xf0]  ;;  %v1664_v52 = vor.u32 %v1867_v49, %v1663_v47  ;;  %v1340_v53 = vor.u32 %v1786_v44, %v1339_v43 }
  0x24   :  { %851 = vmatpush.bf16.msra.mxu0 %v1364_v32  ;;  %877 = vmatpush.bf16.msrb.mxu2 %v1556_v33  ;;  %v1532_v54 = vor.u32 %v1834_v46, %v1531_v45  ;;  %v1327_v55 = vld [vmem:[#allocation8 + $0x48] sm:$0xf]  ;;  %v1651_v56 = vld [vmem:[#allocation8 + $0x2d0] sm:$0xf]  ;;  %v1864_v57 = vld [vmem:[#allocation8 + $0x2d8] sm:$0xf0]  ;;  %v1424_v62 = vor.u32 %v1807_v51, %v1423_v50 }
  0x25   :  { %v1783_v58 = vld [vmem:[#allocation8 + $0x50] sm:$0xf0]  ;;  %v1519_v59 = vld [vmem:[#allocation8 + $0x1c8] sm:$0xf]  ;;  %889 = vmatpush.bf16.msra.mxu3 %v1664_v52  ;;  %v1652_v61 = vor.u32 %v1864_v57, %v1651_v56  ;;  %v1411_v63 = vld [vmem:[#allocation8 + $0xf0] sm:$0xf] }
  0x26   :  { %v1831_v60 = vld [vmem:[#allocation8 + $0x1d0] sm:$0xf0]  ;;  %v1804_v0 = vld [vmem:[#allocation8 + $0xf8] sm:$0xf0]  ;;  %v1639_v1 = vld [vmem:[#allocation8 + $0x2b8] sm:$0xf]  ;;  %v1328_v2 = vor.u32 %v1783_v58, %v1327_v55 }
  0x27   :  { %865 = vmatpush.bf16.msrb.mxu1 %v1448_v38  ;;  %v1520_v3 = vor.u32 %v1831_v60, %v1519_v59  ;;  %v1315_v4 = vld [vmem:[#allocation8 + $0x30] sm:$0xf]  ;;  %v1861_v5 = vld [vmem:[#allocation8 + $0x2c0] sm:$0xf0]  ;;  %v1780_v6 = vld [vmem:[#allocation8 + $0x38] sm:$0xf0]  ;;  %v1412_v10 = vor.u32 %v1804_v0, %v1411_v63 }
  0x28   :  { %852 = vmatpush.bf16.msra.mxu0 %v1352_v41  ;;  %878 = vmatpush.bf16.msrb.mxu2 %v1544_v42  ;;  %v1507_v7 = vld [vmem:[#allocation8 + $0x1b0] sm:$0xf]  ;;  %v1828_v8 = vld [vmem:[#allocation8 + $0x1b8] sm:$0xf0]  ;;  %v1640_v9 = vor.u32 %v1861_v5, %v1639_v1  ;;  %v1627_v11 = vld [vmem:[#allocation8 + $0x2a0] sm:$0xf]  ;;  %v1316_v16 = vor.u32 %v1780_v6, %v1315_v4 }
  0x29   :  { %890 = vmatpush.bf16.msra.mxu3 %v1652_v61  ;;  %v1858_v13 = vld [vmem:[#allocation8 + $0x2a8] sm:$0xf0]  ;;  %v1399_v14 = vld [vmem:[#allocation8 + $0xd8] sm:$0xf]  ;;  %v1801_v15 = vld [vmem:[#allocation8 + $0xe0] sm:$0xf0]  ;;  %v1508_v17 = vor.u32 %v1828_v8, %v1507_v7 }
  0x2a   :  { %v1303_v18 = vld [vmem:[#allocation8 + $0x18] sm:$0xf]  ;;  %v1777_v19 = vld [vmem:[#allocation8 + $0x20] sm:$0xf0]  ;;  %v1628_v22 = vor.u32 %v1858_v13, %v1627_v11  ;;  %v1400_v23 = vor.u32 %v1801_v15, %v1399_v14  ;;  %v1615_v24 = vld [vmem:[#allocation8 + $0x288] sm:$0xf] }
  0x2b   :  { %866 = vmatpush.bf16.msrb.mxu1 %v1436_v48  ;;  %v1495_v20 = vld [vmem:[#allocation8 + $0x198] sm:$0xf]  ;;  %v1825_v21 = vld [vmem:[#allocation8 + $0x1a0] sm:$0xf0]  ;;  %v1387_v25 = vld [vmem:[#allocation8 + $0xc0] sm:$0xf]  ;;  %v1304_v29 = vor.u32 %v1777_v19, %v1303_v18 }
  0x2c   :  { %853 = vmatpush.bf16.msra.mxu0 %v1340_v53  ;;  %879 = vmatpush.bf16.msrb.mxu2 %v1532_v54  ;;  %v1798_v26 = vld [vmem:[#allocation8 + $0xc8] sm:$0xf0]  ;;  %v1473_v28 = vld [vmem:[#allocation8 + $0x174] sm:$0xf0]  ;;  %v1496_v30 = vor.u32 %v1825_v21, %v1495_v20  ;;  %v1291_v31 = vld [vmem:[#allocation8] sm:$0xf] }
  0x2d   :  { %1288 = vmatmul.msk.bf16.vlgmr.msrb.gmra.mxu3 %vm138_vm0, %v2127_v12  ;;  %v1855_v12 = vld [vmem:[#allocation8 + $0x290] sm:$0xf0]  ;;  %v1818_v27 = vld [vmem:[#allocation8 + $0x16c] sm:$0xf]  ;;  %v1483_v33 = vld [vmem:[#allocation8 + $0x180] sm:$0xf]  ;;  %v1388_v37 = vor.u32 %v1798_v26, %v1387_v25 }
  0x2e   :  { %891 = vmatpush.bf16.msra.mxu3 %v1640_v9  ;;  %v1774_v32 = vld [vmem:[#allocation8 + $0x8] sm:$0xf0]  ;;  %v1616_v36 = vor.u32 %v1855_v12, %v1615_v24  ;;  %v1377_v38 = vld [vmem:[#allocation8 + $0xb4] sm:$0xf0]  ;;  %v1476_v41 = vor.u32 %v1818_v27, %v1473_v28  ;;  %v1603_v42 = vld [vmem:[#allocation8 + $0x270] sm:$0xf] }
  0x2f   :  { %867 = vmatpush.bf16.msrb.mxu1 %v1424_v62  ;;  %v1822_v34 = vld [vmem:[#allocation8 + $0x188] sm:$0xf0]  ;;  %v1569_v40 = vld [vmem:[#allocation8 + $0x234] sm:$0xf0]  ;;  %v1852_v43 = vld [vmem:[#allocation8 + $0x278] sm:$0xf0]  ;;  %v1292_v46 = vor.u32 %v1774_v32, %v1291_v31 }
  0x30   :  { %854 = vmatpush.bf16.msra.mxu0 %v1328_v2  ;;  %880 = vmatpush.bf16.msrb.mxu2 %v1520_v3  ;;  %v1794_v35 = vld [vmem:[#allocation8 + $0xac] sm:$0xf]  ;;  %v1815_v44 = vld [vmem:[#allocation8 + $0x154] sm:$0xf]  ;;  %v1461_v45 = vld [vmem:[#allocation8 + $0x15c] sm:$0xf0]  ;;  %v1484_v47 = vor.u32 %v1822_v34, %v1483_v33  ;;  %v1604_v54 = vor.u32 %v1852_v43, %v1603_v42 }
  0x31   :  { %v1842_v39 = vld [vmem:[#allocation8 + $0x22c] sm:$0xf]  ;;  %v1380_v48 = vor.u32 %v1794_v35, %v1377_v38  ;;  %v1791_v50 = vld [vmem:[#allocation8 + $0x94] sm:$0xf]  ;;  %v1365_v51 = vld [vmem:[#allocation8 + $0x9c] sm:$0xf0]  ;;  %v1464_v55 = vor.u32 %v1815_v44, %v1461_v45 }
  0x32   :  { %892 = vmatpush.bf16.msra.mxu3 %v1628_v22  ;;  %v1572_v49 = vor.u32 %v1842_v39, %v1569_v40  ;;  %v1839_v52 = vld [vmem:[#allocation8 + $0x214] sm:$0xf]  ;;  %v1557_v53 = vld [vmem:[#allocation8 + $0x21c] sm:$0xf0]  ;;  %v1591_v56 = vld [vmem:[#allocation8 + $0x258] sm:$0xf]  ;;  %v1368_v60 = vor.u32 %v1791_v50, %v1365_v51 }
  0x33   :  { %868 = vmatpush.bf16.msrb.mxu1 %v1412_v10  ;;  %v1849_v57 = vld [vmem:[#allocation8 + $0x260] sm:$0xf0]  ;;  %v1812_v58 = vld [vmem:[#allocation8 + $0x13c] sm:$0xf]  ;;  %v1449_v59 = vld [vmem:[#allocation8 + $0x144] sm:$0xf0]  ;;  %v1560_v61 = vor.u32 %v1839_v52, %v1557_v53 }
  0x34   :  { %855 = vmatpush.bf16.msra.mxu0 %v1316_v16  ;;  %881 = vmatpush.bf16.msrb.mxu2 %v1508_v17  ;;  %v1788_v62 = vld [vmem:[#allocation8 + $0x7c] sm:$0xf]  ;;  %v1353_v63 = vld [vmem:[#allocation8 + $0x84] sm:$0xf0]  ;;  %v1592_v2 = vor.u32 %v1849_v57, %v1591_v56  ;;  %v1452_v3 = vor.u32 %v1812_v58, %v1449_v59  ;;  %v1809_v4 = vld [vmem:[#allocation8 + $0x124] sm:$0xf] }
  0x35   :  { %v1836_v0 = vld [vmem:[#allocation8 + $0x1fc] sm:$0xf]  ;;  %v1545_v1 = vld [vmem:[#allocation8 + $0x204] sm:$0xf0]  ;;  %v1437_v5 = vld [vmem:[#allocation8 + $0x12c] sm:$0xf0]  ;;  %v1356_v6 = vor.u32 %v1788_v62, %v1353_v63 }
  0x36   :  { %893 = vmatpush.bf16.msra.mxu3 %v1616_v36  ;;  %v1548_v7 = vor.u32 %v1836_v0, %v1545_v1  ;;  %v1785_v8 = vld [vmem:[#allocation8 + $0x64] sm:$0xf]  ;;  %v1341_v9 = vld [vmem:[#allocation8 + $0x6c] sm:$0xf0]  ;;  %v1440_v13 = vor.u32 %v1809_v4, %v1437_v5  ;;  %v1806_v14 = vld [vmem:[#allocation8 + $0x10c] sm:$0xf] }
  0x37   :  { %869 = vmatpush.bf16.msrb.mxu1 %v1400_v23  ;;  %v1833_v10 = vld [vmem:[#allocation8 + $0x1e4] sm:$0xf]  ;;  %v1533_v11 = vld [vmem:[#allocation8 + $0x1ec] sm:$0xf0]  ;;  %v1425_v15 = vld [vmem:[#allocation8 + $0x114] sm:$0xf0]  ;;  %v1344_v16 = vor.u32 %v1785_v8, %v1341_v9 }
  0x38   :  { %856 = vmatpush.bf16.msra.mxu0 %v1304_v29  ;;  %882 = vmatpush.bf16.msrb.mxu2 %v1496_v30  ;;  %v1536_v17 = vor.u32 %v1833_v10, %v1533_v11  ;;  %v1428_v18 = vor.u32 %v1806_v14, %v1425_v15  ;;  %v1803_v19 = vld [vmem:[#allocation8 + $0xf4] sm:$0xf]  ;;  %v1413_v20 = vld [vmem:[#allocation8 + $0xfc] sm:$0xf0]  ;;  %v1846_v23 = vld [vmem:[#allocation8 + $0x248] sm:$0xf0] }
  0x39   :  { %v1416_v21 = vor.u32 %v1803_v19, %v1413_v20  ;;  %v1579_v22 = vld [vmem:[#allocation8 + $0x240] sm:$0xf]  ;;  %v1782_v12 = vld [vmem:[#allocation8 + $0x4c] sm:$0xf]  ;;  %v1329_v25 = vld [vmem:[#allocation8 + $0x54] sm:$0xf0] }
  0x3a   :  { %894 = vmatpush.bf16.msra.mxu3 %v1604_v54  ;;  %v1580_v24 = vor.u32 %v1846_v23, %v1579_v22  ;;  %v1830_v26 = vld [vmem:[#allocation8 + $0x1cc] sm:$0xf]  ;;  %v1332_v27 = vor.u32 %v1782_v12, %v1329_v25  ;;  %v1521_v28 = vld [vmem:[#allocation8 + $0x1d4] sm:$0xf0]  ;;  %v1800_v33 = vld [vmem:[#allocation8 + $0xdc] sm:$0xf] }
  0x3b   :  { %870 = vmatpush.bf16.msrb.mxu1 %v1388_v37  ;;  %v1866_v29 = vld [vmem:[#allocation8 + $0x2ec] sm:$0xf]  ;;  %v1665_v30 = vld [vmem:[#allocation8 + $0x2f4] sm:$0xf0]  ;;  %v1524_v31 = vor.u32 %v1830_v26, %v1521_v28  ;;  %v1401_v34 = vld [vmem:[#allocation8 + $0xe4] sm:$0xf0] }
  0x3c   :  { %857 = vmatpush.bf16.msra.mxu0 %v1292_v46  ;;  %883 = vmatpush.bf16.msrb.mxu2 %v1484_v47  ;;  %v1668_v32 = vor.u32 %v1866_v29, %v1665_v30  ;;  %v1404_v35 = vor.u32 %v1800_v33, %v1401_v34  ;;  %v1779_v36 = vld [vmem:[#allocation8 + $0x34] sm:$0xf]  ;;  %v1317_v37 = vld [vmem:[#allocation8 + $0x3c] sm:$0xf0]  ;;  %v1797_v45 = vld [vmem:[#allocation8 + $0xc4] sm:$0xf] }
  0x3d   :  { %v1827_v38 = vld [vmem:[#allocation8 + $0x1b4] sm:$0xf]  ;;  %v1320_v39 = vor.u32 %v1779_v36, %v1317_v37  ;;  %v1509_v40 = vld [vmem:[#allocation8 + $0x1bc] sm:$0xf0]  ;;  %v1389_v46 = vld [vmem:[#allocation8 + $0xcc] sm:$0xf0] }
  0x3e   :  { %895 = vmatpush.bf16.msra.mxu3 %v1592_v2  ;;  %v1653_v42 = vld [vmem:[#allocation8 + $0x2dc] sm:$0xf0]  ;;  %v1512_v43 = vor.u32 %v1827_v38, %v1509_v40  ;;  %v1392_v47 = vor.u32 %v1797_v45, %v1389_v46  ;;  %v1824_v50 = vld [vmem:[#allocation8 + $0x19c] sm:$0xf]  ;;  %v1497_v52 = vld [vmem:[#allocation8 + $0x1a4] sm:$0xf0] }
  0x3f   :  { %915 = vmatpush.bf16.msra.mxu1 %v1476_v41  ;;  %v1863_v41 = vld [vmem:[#allocation8 + $0x2d4] sm:$0xf]  ;;  %v1860_v53 = vld [vmem:[#allocation8 + $0x2bc] sm:$0xf]  ;;  %v1641_v54 = vld [vmem:[#allocation8 + $0x2c4] sm:$0xf0] }
  0x40   :  { %902 = vmatpush.bf16.msrb.mxu0 %v1380_v48  ;;  %928 = vmatpush.bf16.msra.mxu2 %v1572_v49  ;;  %v1656_v44 = vor.u32 %v1863_v41, %v1653_v42  ;;  %v1776_v48 = vld [vmem:[#allocation8 + $0x1c] sm:$0xf]  ;;  %v1305_v49 = vld [vmem:[#allocation8 + $0x24] sm:$0xf0]  ;;  %v1644_v56 = vor.u32 %v1860_v53, %v1641_v54  ;;  %v1773_v57 = vld [vmem:[#allocation8 + $0x4] sm:$0xf] }
  0x41   :  { %v1308_v51 = vor.u32 %v1776_v48, %v1305_v49  ;;  %v1293_v58 = vld [vmem:[#allocation8 + $0xc] sm:$0xf0]  ;;  %v1821_v59 = vld [vmem:[#allocation8 + $0x184] sm:$0xf]  ;;  %v1854_v2 = vld [vmem:[#allocation8 + $0x28c] sm:$0xf] }
  0x42   :  { %896 = vmatpush.bf16.msra.mxu3 %v1580_v24  ;;  %v1857_v62 = vld [vmem:[#allocation8 + $0x2a4] sm:$0xf]  ;;  %v1629_v63 = vld [vmem:[#allocation8 + $0x2ac] sm:$0xf0]  ;;  %v1851_v5 = vld [vmem:[#allocation8 + $0x274] sm:$0xf] }
  0x43   :  { %916 = vmatpush.bf16.msra.mxu1 %v1464_v55  ;;  %v1500_v55 = vor.u32 %v1824_v50, %v1497_v52  ;;  %v1632_v1 = vor.u32 %v1857_v62, %v1629_v63  ;;  %v1848_v8 = vld [vmem:[#allocation8 + $0x25c] sm:$0xf]  ;;  %v1593_v9 = vld [vmem:[#allocation8 + $0x264] sm:$0xf0]  ;;  %v1581_v14 = vld [vmem:[#allocation8 + $0x24c] sm:$0xf0] }
  0x44   :  { %903 = vmatpush.bf16.msrb.mxu0 %v1368_v60  ;;  %929 = vmatpush.bf16.msra.mxu2 %v1560_v61  ;;  %v1296_v60 = vor.u32 %v1773_v57, %v1293_v58  ;;  %v1485_v61 = vld [vmem:[#allocation8 + $0x18c] sm:$0xf0]  ;;  %v1596_v10 = vor.u32 %v1848_v8, %v1593_v9  ;;  %v2137_v11 = vld [vmem:[#allocation7] sm:$0xf]  ;;  %v1467_v26 = vld [vmem:[#allocation8 + $0x158] sm:$0xf] }
  0x45   :  { %v1488_v0 = vor.u32 %v1821_v59, %v1485_v61  ;;  %v1479_v19 = vld [vmem:[#allocation8 + $0x170] sm:$0xf]  ;;  %v1820_v20 = vld [vmem:[#allocation8 + $0x178] sm:$0xf0]  ;;  %v112_v23 = vperm.slane %v2137_v11, 2  ;;  %s1257_s11 = sshll.u32 %s2179_s7, 4  ;;  %s1258_s11 = int_to_ptr.hbm [resolvable:$true] %s1257_s11 }
  0x46   :  { %941 = vmatpush.bf16.msrb.mxu3 %v1668_v32  ;;  %v1480_v24 = vor.u32 %v1820_v20, %v1479_v19  ;;  %v1383_v30 = vld [vmem:[#allocation8 + $0xb0] sm:$0xf]  ;;  %v1844_v34 = vld [vmem:[#allocation8 + $0x238] sm:$0xf0]  ;;  %v1455_v40 = vld [vmem:[#allocation8 + $0x140] sm:$0xf] }
  0x47   :  { %917 = vmatpush.bf16.msra.mxu1 %v1452_v3  ;;  %v1617_v3 = vld [vmem:[#allocation8 + $0x294] sm:$0xf0]  ;;  %v1575_v33 = vld [vmem:[#allocation8 + $0x230] sm:$0xf]  ;;  %v1814_v41 = vld [vmem:[#allocation8 + $0x148] sm:$0xf0] }
  0x48   :  { %904 = vmatpush.bf16.msrb.mxu0 %v1356_v6  ;;  %930 = vmatpush.bf16.msra.mxu2 %v1548_v7  ;;  %v1620_v4 = vor.u32 %v1854_v2, %v1617_v3  ;;  %v1605_v6 = vld [vmem:[#allocation8 + $0x27c] sm:$0xf0]  ;;  %v1793_v45 = vld [vmem:[#allocation8 + $0xa0] sm:$0xf0]  ;;  %v1456_v49 = vor.u32 %v1814_v41, %v1455_v40  ;;  %v1443_v52 = vld [vmem:[#allocation8 + $0x128] sm:$0xf] }
  0x49   :  { %v1608_v7 = vor.u32 %v1851_v5, %v1605_v6  ;;  %v1841_v48 = vld [vmem:[#allocation8 + $0x220] sm:$0xf0]  ;;  %v1811_v53 = vld [vmem:[#allocation8 + $0x130] sm:$0xf0]  ;;  %v1790_v57 = vld [vmem:[#allocation8 + $0x88] sm:$0xf0] }
  0x4a   :  { %942 = vmatpush.bf16.msrb.mxu3 %v1656_v44  ;;  %v1371_v44 = vld [vmem:[#allocation8 + $0x98] sm:$0xf]  ;;  %v1551_v58 = vld [vmem:[#allocation8 + $0x200] sm:$0xf]  ;;  %v1838_v59 = vld [vmem:[#allocation8 + $0x208] sm:$0xf0] }
  0x4b   :  { %918 = vmatpush.bf16.msra.mxu1 %v1440_v13  ;;  %v1845_v13 = vld [vmem:[#allocation8 + $0x244] sm:$0xf]  ;;  %v1431_v62 = vld [vmem:[#allocation8 + $0x110] sm:$0xf]  ;;  %v1808_v63 = vld [vmem:[#allocation8 + $0x118] sm:$0xf0] }
  0x4c   :  { %905 = vmatpush.bf16.msrb.mxu0 %v1344_v16  ;;  %931 = vmatpush.bf16.msra.mxu2 %v1536_v17  ;;  %v1584_v15 = vor.u32 %v1845_v13, %v1581_v14  ;;  %v111_v16 = vperm.slane %v2137_v11, 1  ;;  %v1347_v2 = vld [vmem:[#allocation8 + $0x68] sm:$0xf]  ;;  %v1787_v3 = vld [vmem:[#allocation8 + $0x70] sm:$0xf0]  ;;  %v1432_v6 = vor.u32 %v1808_v63, %v1431_v62 }
  0x4d   :  { %v1835_v5 = vld [vmem:[#allocation8 + $0x1f0] sm:$0xf0]  ;;  %v1348_v8 = vor.u32 %v1787_v3, %v1347_v2  ;;  %v1419_v9 = vld [vmem:[#allocation8 + $0xf8] sm:$0xf]  ;;  %v1671_v20 = vld [vmem:[#allocation8 + $0x2f0] sm:$0xf] }
  0x4e   :  { %943 = vmatpush.bf16.msrb.mxu3 %v1644_v56  ;;  %v1359_v56 = vld [vmem:[#allocation8 + $0x80] sm:$0xf]  ;;  %v1623_v62 = vld [vmem:[#allocation8 + $0x290] sm:$0xf]  ;;  %v1856_v63 = vld [vmem:[#allocation8 + $0x298] sm:$0xf0] }
  0x4f   :  { %919 = vmatpush.bf16.msra.mxu1 %v1428_v18  ;;  %v1360_v61 = vor.u32 %v1790_v57, %v1359_v56  ;;  %v1311_v40 = vld [vmem:[#allocation8 + $0x20] sm:$0xf]  ;;  %v1823_v56 = vld [vmem:[#allocation8 + $0x190] sm:$0xf0]  ;;  %v1635_v57 = vld [vmem:[#allocation8 + $0x2a8] sm:$0xf] }
  0x50   :  { %906 = vmatpush.bf16.msrb.mxu0 %v1332_v27  ;;  %932 = vmatpush.bf16.msra.mxu2 %v1524_v31  ;;  %v1817_v27 = vld [vmem:[#allocation8 + $0x160] sm:$0xf0]  ;;  %v1796_v31 = vld [vmem:[#allocation8 + $0xb8] sm:$0xf0] }
  0x51   :  { %v1468_v36 = vor.u32 %v1817_v27, %v1467_v26  ;;  %v1323_v27 = vld [vmem:[#allocation8 + $0x38] sm:$0xf]  ;;  %v1853_v2 = vld [vmem:[#allocation8 + $0x280] sm:$0xf0] }
  0x52   :  { %944 = vmatpush.bf16.msrb.mxu3 %v1632_v1  ;;  %v1552_v1 = vor.u32 %v1838_v59, %v1551_v58  ;;  %v1859_v58 = vld [vmem:[#allocation8 + $0x2b0] sm:$0xf0] }
  0x53   :  { %920 = vmatpush.bf16.msra.mxu1 %v1416_v21  ;;  %v110_v21 = vperm.slane %v2137_v11, 0 }
  0x54   :  { %907 = vmatpush.bf16.msrb.mxu0 %v1320_v39  ;;  %933 = vmatpush.bf16.msra.mxu2 %v1512_v43  ;;  %v1384_v39 = vor.u32 %v1796_v31, %v1383_v30  ;;  %v1576_v43 = vor.u32 %v1844_v34, %v1575_v33  ;;  %v1515_v30 = vld [vmem:[#allocation8 + $0x1b8] sm:$0xf]  ;;  %v1829_v31 = vld [vmem:[#allocation8 + $0x1c0] sm:$0xf0] }
  0x55   :  { %v1659_v33 = vld [vmem:[#allocation8 + $0x2d8] sm:$0xf]  ;;  %v1865_v34 = vld [vmem:[#allocation8 + $0x2e0] sm:$0xf0] }
  0x56   :  { %945 = vmatpush.bf16.msrb.mxu3 %v1620_v4  ;;  %v1539_v4 = vld [vmem:[#allocation8 + $0x1e8] sm:$0xf]  ;;  %v1660_v41 = vor.u32 %v1865_v34, %v1659_v33  ;;  %v1889_v33 = vld [vmem:[#allocation10 + $0xa0] sm:$0xff] }
  0x57   :  { %921 = vmatpush.bf16.msra.mxu1 %v1404_v35  ;;  %v1540_v14 = vor.u32 %v1835_v5, %v1539_v4  ;;  %v1599_v4 = vld [vmem:[#allocation8 + $0x260] sm:$0xf]  ;;  %v1850_v5 = vld [vmem:[#allocation8 + $0x268] sm:$0xf0] }
  0x58   :  { %908 = vmatpush.bf16.msrb.mxu0 %v1308_v51  ;;  %934 = vmatpush.bf16.msra.mxu2 %v1500_v55  ;;  %v1372_v51 = vor.u32 %v1793_v45, %v1371_v44  ;;  %v1503_v44 = vld [vmem:[#allocation8 + $0x1a0] sm:$0xf]  ;;  %v1826_v45 = vld [vmem:[#allocation8 + $0x1a8] sm:$0xf0] }
  0x5a   :  { %946 = vmatpush.bf16.msrb.mxu3 %v1608_v7 }
  0x5b   :  { %922 = vmatpush.bf16.msra.mxu1 %v1392_v47  ;;  %v1563_v47 = vld [vmem:[#allocation8 + $0x218] sm:$0xf] }
  0x5c   :  { %909 = vmatpush.bf16.msrb.mxu0 %v1296_v60  ;;  %935 = vmatpush.bf16.msra.mxu2 %v1488_v0  ;;  %v1564_v54 = vor.u32 %v1841_v48, %v1563_v47  ;;  %v1444_v60 = vor.u32 %v1811_v53, %v1443_v52  ;;  %v113_v0 = vperm.slane %v2137_v11, 3  ;;  %v1527_v11 = vld [vmem:[#allocation8 + $0x1d0] sm:$0xf]  ;;  %v1647_v48 = vld [vmem:[#allocation8 + $0x2c0] sm:$0xf] }
  0x5d   :  { %v1299_v52 = vld [vmem:[#allocation8 + $0x8] sm:$0xf] }
  0x5e   :  { %947 = vmatpush.bf16.msrb.mxu3 %v1596_v10  ;;  %v1805_v10 = vld [vmem:[#allocation8 + $0x100] sm:$0xf0] }
  0x5f   :  { %v1420_v19 = vor.u32 %v1805_v10, %v1419_v9  ;;  %v1876_v9 = vld [vmem:[#allocation10 + $0x38] sm:$0xff]  ;;  %v1875_v10 = vld [vmem:[#allocation10 + $0x30] sm:$0xff] }
  0x62   :  { %948 = vmatpush.bf16.msrb.mxu3 %v1584_v15  ;;  %v1335_v15 = vld [vmem:[#allocation8 + $0x50] sm:$0xf] }
  0x9b   :  { %v164_v17 = vpop.f32.mrf.mxu1 }
  0x9c   :  { %v165_v18 = vadd.f32 %v164_v17, %v111_v16  ;;  %v1784_v16 = vld [vmem:[#allocation8 + $0x58] sm:$0xf0] }
  0x9d   :  { %v1832_v17 = vld [vmem:[#allocation8 + $0x1d8] sm:$0xf0] }
  0x9e   :  { %v195_v22 = vmax.f32 %v165_v18, 0.0  ;;  %v1528_v26 = vor.u32 %v1832_v17, %v1527_v11  ;;  %v1870_v11 = vld [vmem:[#allocation10 + $0x8] sm:$0xff] }
  0x9f   :  { %v1882_v17 = vld [vmem:[#allocation10 + $0x68] sm:$0xff] }
  0xa0   :  { %v2142_v12 = vpack.c.bf16 %v195_v22, %v195_v22  ;;  %v151_v25 = vpop.f32.mrf.mxu3  ;;  %v1407_v22 = vld [vmem:[#allocation8 + $0xe0] sm:$0xf] }
  0xa1   :  { %v152_v28 = vadd.f32 %v151_v25, %v110_v21  ;;  %v1868_v21 = vld [vmem:[#allocation8 + $0x2f8] sm:$0xf0]  ;;  %v1336_v25 = vor.u32 %v1784_v16, %v1335_v15  ;;  %v1871_v15 = vld [vmem:[#allocation10 + $0x10] sm:$0xff] }
  0xa2   :  { %v177_v29 = vpop.f32.mrf.mxu2  ;;  %871 = vmatmul.bf16.vlgmr.msrb.gmra.mxu1 %v2142_v12  ;;  %v1883_v16 = vld [vmem:[#allocation10 + $0x70] sm:$0xff] }
  0xa3   :  { %v178_v32 = vadd.f32 %v177_v29, %v112_v23  ;;  %v194_v35 = vmax.f32 %v152_v28, 0.0  ;;  %967 = vmatpush.bf16.msrb.mxu1 %v1480_v24  ;;  %v166_v37 = vpop.f32.mrf.mxu1  ;;  %v1802_v23 = vld [vmem:[#allocation8 + $0xe8] sm:$0xf0]  ;;  %v1672_v28 = vor.u32 %v1868_v21, %v1671_v20  ;;  %v1781_v29 = vld [vmem:[#allocation8 + $0x40] sm:$0xf0]  ;;  %v1880_v21 = vld [vmem:[#allocation10 + $0x58] sm:$0xff] }
  0xa4   :  { %v1799_v37 = vld [vmem:[#allocation8 + $0xd0] sm:$0xf0] }
  0xa5   :  { %v196_v38 = vmax.f32 %v178_v32, 0.0  ;;  %v2145_v42 = vpack.c.bf16 %v194_v35, %v194_v35  ;;  %v1408_v32 = vor.u32 %v1802_v23, %v1407_v22  ;;  %v1892_v22 = vld [vmem:[#allocation10 + $0xb8] sm:$0xff] }
  0xa7   :  { %v2147_v46 = vpack.c.bf16 %v196_v38, %v196_v38  ;;  %968 = vmatpush.bf16.msrb.mxu1 %v1468_v36  ;;  %858 = vmatmul.bf16.vlgmr.msra.gmra.mxu0 %v2145_v42  ;;  %v1395_v36 = vld [vmem:[#allocation8 + $0xc8] sm:$0xf]  ;;  %v1324_v38 = vor.u32 %v1781_v29, %v1323_v27 }
  0xa8   :  { %v153_v50 = vpop.f32.mrf.mxu3  ;;  %954 = vmatpush.bf16.msra.mxu0 %v1384_v39  ;;  %v1516_v39 = vor.u32 %v1829_v31, %v1515_v30  ;;  %v1396_v47 = vor.u32 %v1799_v37, %v1395_v36  ;;  %v1878_v27 = vld [vmem:[#allocation10 + $0x48] sm:$0xff]  ;;  %v330_v30 = vld [vmem:[%s2176_s4] sm:$0x7]  ;;  %v1888_v36 = vld [vmem:[#allocation10 + $0x98] sm:$0xff] }
  0xa9   :  { %884 = vmatmul.bf16.vlgmr.msrb.gmra.mxu2 %v2147_v46  ;;  %v332_v34 = vperm.slane %v330_v30, 0 }
  0xaa   :  { %980 = vmatpush.bf16.msrb.mxu2 %v1576_v43  ;;  %v179_v55 = vpop.f32.mrf.mxu2  ;;  %v1778_v43 = vld [vmem:[#allocation8 + $0x28] sm:$0xf0] }
  0xab   :  { %969 = vmatpush.bf16.msrb.mxu1 %v1456_v49  ;;  %v1862_v49 = vld [vmem:[#allocation8 + $0x2c8] sm:$0xf0]  ;;  %v1312_v50 = vor.u32 %v1778_v43, %v1311_v40  ;;  %v1491_v55 = vld [vmem:[#allocation8 + $0x188] sm:$0xf] }
  0xac   :  { %955 = vmatpush.bf16.msra.mxu0 %v1372_v51  ;;  %v1504_v51 = vor.u32 %v1826_v45, %v1503_v44  ;;  %v1648_v53 = vor.u32 %v1862_v49, %v1647_v48 }
  0xae   :  { %981 = vmatpush.bf16.msrb.mxu2 %v1564_v54  ;;  %v1775_v54 = vld [vmem:[#allocation8 + $0x10] sm:$0xf0] }
  0xaf   :  { %970 = vmatpush.bf16.msrb.mxu1 %v1444_v60  ;;  %v1300_v59 = vor.u32 %v1775_v54, %v1299_v52  ;;  %v1492_v60 = vor.u32 %v1823_v56, %v1491_v55  ;;  %v1885_v52 = vld [vmem:[#allocation10 + $0x80] sm:$0xff] }
  0xb0   :  { %v190_v7 = vpop.f32.mrf.mxu3  ;;  %956 = vmatpush.bf16.msra.mxu0 %v1360_v61  ;;  %v1636_v61 = vor.u32 %v1859_v58, %v1635_v57 }
  0xb1   :  { %v191_v13 = vadd.f32 %v190_v7, %v113_v0  ;;  %v1624_v0 = vor.u32 %v1856_v63, %v1623_v62  ;;  %v1847_v7 = vld [vmem:[#allocation8 + $0x250] sm:$0xf0] }
  0xb2   :  { %982 = vmatpush.bf16.msrb.mxu2 %v1552_v1  ;;  %923 = vmatmul.bf16.vlgmr.msra.gmra.mxu1 %v2142_v12  ;;  %v1611_v1 = vld [vmem:[#allocation8 + $0x278] sm:$0xf] }
  0xb3   :  { %v197_v18 = vmax.f32 %v191_v13, 0.0  ;;  %971 = vmatpush.bf16.msrb.mxu1 %v1432_v6  ;;  %v1612_v3 = vor.u32 %v1853_v2, %v1611_v1  ;;  %v1587_v6 = vld [vmem:[#allocation8 + $0x248] sm:$0xf]  ;;  %v1872_v13 = vld [vmem:[#allocation10 + $0x18] sm:$0xff] }
  0xb4   :  { %957 = vmatpush.bf16.msra.mxu0 %v1348_v8  ;;  %v1588_v8 = vor.u32 %v1847_v7, %v1587_v6 }
  0xb5   :  { %v2153_v24 = vpack.c.bf16 %v197_v18, %v197_v18  ;;  %v1869_v18 = vld [vmem:[#allocation10] sm:$0xff] }
  0xb6   :  { %983 = vmatpush.bf16.msrb.mxu2 %v1540_v14  ;;  %v1884_v14 = vld [vmem:[#allocation10 + $0x78] sm:$0xff] }
  0xb7   :  { %972 = vmatpush.bf16.msrb.mxu1 %v1420_v19  ;;  %897 = vmatmul.bf16.vlgmr.msra.gmra.mxu3 %v2153_v24  ;;  %v1881_v19 = vld [vmem:[#allocation10 + $0x60] sm:$0xff] }
  0xb8   :  { %910 = vmatmul.bf16.vlgmr.msrb.gmra.mxu0 %v2145_v42  ;;  %v192_v35 = vpop.f32.mrf.mxu3  ;;  %993 = vmatpush.bf16.msra.mxu3 %v1672_v28  ;;  %v1890_v28 = vld [vmem:[#allocation10 + $0xa8] sm:$0xff] }
  0xb9   :  { %936 = vmatmul.bf16.vlgmr.msra.gmra.mxu2 %v2147_v46  ;;  %958 = vmatpush.bf16.msra.mxu0 %v1336_v25  ;;  %v1891_v25 = vld [vmem:[#allocation10 + $0xb0] sm:$0xff] }
  0xba   :  { %984 = vmatpush.bf16.msrb.mxu2 %v1528_v26 }
  0xbb   :  { %973 = vmatpush.bf16.msrb.mxu1 %v1408_v32  ;;  %v1877_v32 = vld [vmem:[#allocation10 + $0x40] sm:$0xff] }
  0xbc   :  { %994 = vmatpush.bf16.msra.mxu3 %v1660_v41 }
  0xbd   :  { %959 = vmatpush.bf16.msra.mxu0 %v1324_v38 }
  0xbe   :  { %985 = vmatpush.bf16.msrb.mxu2 %v1516_v39  ;;  %v1887_v39 = vld [vmem:[#allocation10 + $0x90] sm:$0xff] }
  0xbf   :  { %974 = vmatpush.bf16.msrb.mxu1 %v1396_v47  ;;  %v1886_v47 = vld [vmem:[#allocation10 + $0x88] sm:$0xff] }
  0xc0   :  { %995 = vmatpush.bf16.msra.mxu3 %v1648_v53  ;;  %v333_v53 = vperm.slane %v330_v30, 1 }
  0xc1   :  { %960 = vmatpush.bf16.msra.mxu0 %v1312_v50 }
  0xc2   :  { %986 = vmatpush.bf16.msrb.mxu2 %v1504_v51  ;;  %975 = vmatmul.bf16.vlgmr.msrb.gmra.mxu1 %v2142_v12  ;;  %v1600_v12 = vor.u32 %v1850_v5, %v1599_v4  ;;  %v334_v5 = vperm.slane %v330_v30, 2 }
  0xc3   :  { %1221 = vmatpush.bf16.msra.mxu1 %v1884_v14 }
  0xc4   :  { %996 = vmatpush.bf16.msra.mxu3 %v1636_v61 }
  0xc5   :  { %961 = vmatpush.bf16.msra.mxu0 %v1300_v59 }
  0xc6   :  { %987 = vmatpush.bf16.msrb.mxu2 %v1492_v60 }
  0xc7   :  { %949 = vmatmul.bf16.vlgmr.msrb.gmra.mxu3 %v2153_v24  ;;  %1222 = vmatpush.bf16.msra.mxu1 %v1883_v16 }
  0xc8   :  { %962 = vmatmul.bf16.vlgmr.msra.gmra.mxu0 %v2145_v42  ;;  %997 = vmatpush.bf16.msra.mxu3 %v1624_v0  ;;  %v1874_v42 = vld [vmem:[#allocation10 + $0x28] sm:$0xff] }
  0xc9   :  { %988 = vmatmul.bf16.vlgmr.msrb.gmra.mxu2 %v2147_v46  ;;  %1208 = vmatpush.bf16.msrb.mxu0 %v1876_v9  ;;  %v1873_v46 = vld [vmem:[#allocation10 + $0x20] sm:$0xff] }
  0xca   :  { %1234 = vmatpush.bf16.msra.mxu2 %v1892_v22 }
  0xcb   :  { %1223 = vmatpush.bf16.msra.mxu1 %v1882_v17 }
  0xcc   :  { %998 = vmatpush.bf16.msra.mxu3 %v1612_v3 }
  0xcd   :  { %1209 = vmatpush.bf16.msrb.mxu0 %v1875_v10 }
  0xce   :  { %1235 = vmatpush.bf16.msra.mxu2 %v1891_v25 }
  0xcf   :  { %1224 = vmatpush.bf16.msra.mxu1 %v1881_v19 }
  0xd0   :  { %999 = vmatpush.bf16.msra.mxu3 %v1600_v12 }
  0xd1   :  { %1210 = vmatpush.bf16.msrb.mxu0 %v1874_v42 }
  0xd2   :  { %1236 = vmatpush.bf16.msra.mxu2 %v1890_v28 }
  0xd3   :  { %1225 = vmatpush.bf16.msra.mxu1 %v1880_v21 }
  0xd4   :  { %1000 = vmatpush.bf16.msra.mxu3 %v1588_v8 }
  0xd5   :  { %1211 = vmatpush.bf16.msrb.mxu0 %v1873_v46 }
  0xd6   :  { %1237 = vmatpush.bf16.msra.mxu2 %v1889_v33 }
  0xd7   :  { %1001 = vmatmul.bf16.vlgmr.msra.gmra.mxu3 %v2153_v24  ;;  %v1879_v24 = vld [vmem:[#allocation10 + $0x50] sm:$0xff] }
  0xd8   :  { %1226 = vmatpush.bf16.msra.mxu1 %v1879_v24 }
  0xd9   :  { %1212 = vmatpush.bf16.msrb.mxu0 %v1872_v13 }
  0xda   :  { %1238 = vmatpush.bf16.msra.mxu2 %v1888_v36 }
  0xdc   :  { %1227 = vmatpush.bf16.msra.mxu1 %v1878_v27 }
  0xdd   :  { %1213 = vmatpush.bf16.msrb.mxu0 %v1871_v15 }
  0xde   :  { %1239 = vmatpush.bf16.msra.mxu2 %v1887_v39 }
  0xe0   :  { %1228 = vmatpush.bf16.msra.mxu1 %v1877_v32 }
  0xe1   :  { %1214 = vmatpush.bf16.msrb.mxu0 %v1870_v11 }
  0xe2   :  { %1240 = vmatpush.bf16.msra.mxu2 %v1886_v47 }
  0xe5   :  { %1215 = vmatpush.bf16.msrb.mxu0 %v1869_v18  ;;  %v1905_v18 = vld [vmem:[%s2178_s6] ss:$0 sm:$0xff] }
  0xe6   :  { %1241 = vmatpush.bf16.msra.mxu2 %v1885_v52 }
 0x11f   :  { %v872_v20 = vpop.f32.mrf.mxu1 }
 0x124   :  { %v859_v23 = vpop.f32.mrf.mxu0 }
 0x125   :  { %v860_v37 = vadd.f32 %v859_v23, %v332_v34 }
 0x127   :  { %v874_v26 = vpop.f32.mrf.mxu1  ;;  %v873_v41 = vadd.f32 %v872_v20, %v860_v37 }
 0x12c   :  { %v885_v29 = vpop.f32.mrf.mxu2  ;;  %v861_v31 = vpop.f32.mrf.mxu0 }
 0x12d   :  { %v886_v44 = vadd.f32 %v885_v29, %v873_v41 }
 0x12f   :  { %v924_v35 = vpop.f32.mrf.mxu1 }
 0x134   :  { %v887_v38 = vpop.f32.mrf.mxu2 }
 0x135   :  { %v911_v40 = vpop.f32.mrf.mxu0 }
 0x136   :  { %v912_v57 = vadd.f32 %v911_v40, %v333_v53 }
 0x137   :  { %v926_v43 = vpop.f32.mrf.mxu1 }
 0x138   :  { %v925_v60 = vadd.f32 %v924_v35, %v912_v57 }
 0x13a   :  { %v898_v45 = vpop.f32.mrf.mxu3 }
 0x13b   :  { %v899_v48 = vadd.f32 %v898_v45, %v886_v44 }
 0x13c   :  { %v937_v49 = vpop.f32.mrf.mxu2 }
 0x13d   :  { %v1006_v50 = vmax.f32 %v899_v48, 0.0  ;;  %v913_v51 = vpop.f32.mrf.mxu0  ;;  %v938_v62 = vadd.f32 %v937_v49, %v925_v60 }
 0x13f   :  { %v1009_v54 = vpack.c.bf16 %v1006_v50, %v1006_v50  ;;  %v976_v55 = vpop.f32.mrf.mxu1 }
 0x141   :  { %1216 = vmatmul.bf16.vlgmr.msrb.gmra.mxu0 %v1009_v54 }
 0x142   :  { %v900_v56 = vpop.f32.mrf.mxu3 }
 0x144   :  { %v939_v58 = vpop.f32.mrf.mxu2 }
 0x145   :  { %v963_v59 = vpop.f32.mrf.mxu0 }
 0x146   :  { %v964_v7 = vadd.f32 %v963_v59, %v334_v5 }
 0x147   :  { %v978_v61 = vpop.f32.mrf.mxu1 }
 0x148   :  { %v977_v8 = vadd.f32 %v976_v55, %v964_v7 }
 0x14a   :  { %v950_v63 = vpop.f32.mrf.mxu3 }
 0x14b   :  { %v951_v0 = vadd.f32 %v950_v63, %v938_v62 }
 0x14c   :  { %v989_v1 = vpop.f32.mrf.mxu2 }
 0x14d   :  { %v1007_v2 = vmax.f32 %v951_v0, 0.0  ;;  %v965_v3 = vpop.f32.mrf.mxu0  ;;  %v990_v9 = vadd.f32 %v989_v1, %v977_v8 }
 0x14f   :  { %v1010_v4 = vpack.c.bf16 %v1007_v2, %v1007_v2 }
 0x151   :  { %1229 = vmatmul.bf16.vlgmr.msra.gmra.mxu1 %v1010_v4 }
 0x152   :  { %v952_v12 = vpop.f32.mrf.mxu3 }
 0x154   :  { %v991_v6 = vpop.f32.mrf.mxu2 }
 0x15a   :  { %v1002_v10 = vpop.f32.mrf.mxu3 }
 0x15b   :  { %v1003_v42 = vadd.f32 %v1002_v10, %v990_v9 }
 0x15d   :  { %v1008_v46 = vmax.f32 %v1003_v42, 0.0 }
 0x15f   :  { %v1011_v13 = vpack.c.bf16 %v1008_v46, %v1008_v46 }
 0x161   :  { %1242 = vmatmul.bf16.vlgmr.msra.gmra.mxu2 %v1011_v13 }
 0x162   :  { %v1004_v14 = vpop.f32.mrf.mxu3 }
 0x1be   :  { %v1217_v15 = vpop.f32.mrf.mxu0 }
 0x1bf   :  { %v1218_v19 = vadd.f32 %v1905_v18, %v1217_v15 }
 0x1c6   :  { %v1219_v16 = vpop.f32.mrf.mxu0 }
 0x1ce   :  { %v1230_v11 = vpop.f32.mrf.mxu1 }
 0x1cf   :  { %v1231_v20 = vadd.f32 %v1230_v11, %v1218_v19 }
 0x1d6   :  { %v1232_v17 = vpop.f32.mrf.mxu1 }
 0x1e4   :  { %v1243_v21 = vpop.f32.mrf.mxu2 }
 0x1e5   :  { %v1244_v22 = vadd.f32 %v1243_v21, %v1231_v20 }
 0x1e7   :  { %1906 = vtanh.f32 %v1244_v22 }
 0x1ec   :  { %v1245_v23 = vpop.f32.mrf.mxu2 }
 0x1ed   :  { %v1907_v24 = vpop.eup %1906 }
 0x1ee   :  { %v1248_v25 = vpack.c.bf16 %v1907_v24, %v1907_v24 }
 0x1f0   :  { %1249 = vst [vmem:[#allocation11] sm:$0xf] %v1248_v25 }
 0x1f1   :  { %1260 = dma.vmem_to_hbm [thread:$0]  %s1256_s8, 64, %s1258_s11, [#allocation4]  }
 0x1f2   :  { %2058 = dma.done.wait [#allocation4], 64  }
 0x1f3   :  { %2059 = vsyncadd [#allocation4], 4294967232 }
 0x1f4   :  { %1265 = vsyncpa [#allocation3], 1 }
 0x1f5   :  { %1266 = vsyncpa [#allocation6], 1 }
 0x1f6   :  { %1267 = vsyncpa [#allocation9], 1 }
 0x1f7   :  { %1268 = vsyncpa [#allocation4], 1 }

</bundles_post_ra>
